<compile_context>
chip_gen: v6e
topology: v6e:2x2x1
jax: 0.10.0
libtpu: 0.0.40
codegen_flags: <defaults>
</compile_context>

<pallas_src>
import jax
import jax.numpy as jnp
from jax.experimental import pallas as pl
from jax.experimental.pallas import tpu as pltpu

F = 151          # logical feature dim of the module
FP = 256         # padded feature dim (multiple of 128 lanes, MXU aligned)


def _selector_kernel(x_ref, w1_ref, b1_ref, w23_ref, b23_ref, o_ref):
    # x = x.float(); h = sigmoid(l1(x))
    x = x_ref[...].astype(jnp.float32)
    h = jax.nn.sigmoid(
        jnp.dot(x, w1_ref[...], preferred_element_type=jnp.float32) + b1_ref[...]
    )
    # Fused l2 | l3: one (TB, FP) x (FP, 2*FP) matmul, lane-dense output.
    o_ref[...] = (
        jnp.dot(h, w23_ref[...], preferred_element_type=jnp.float32) + b23_ref[...]
    ).astype(o_ref.dtype)


def _round_up(n, m):
    return ((n + m - 1) // m) * m


def _pad2(a, rows, cols):
    return jnp.pad(a, ((0, rows - a.shape[0]), (0, cols - a.shape[1])))


def network_selector_forward(x, params, *, block_rows=512):
    """x: (B, 151) float32.

    params: dict with transposed weights w{1,2,3}_t of shape (151, 151) laid out
    (in, out), and biases b{1,2,3} of shape (1, 151).
    Returns (out1, out2), each (B, 151) float32.
    """
    B, f = x.shape
    assert f == F, f"expected {F} input features, got {f}"

    # --- pad / fuse parameters (cheap, done once per call; jit-cacheable) -------
    w1 = _pad2(params["w1_t"].astype(jnp.float32), FP, FP)           # (FP, FP)
    b1 = _pad2(params["b1"].astype(jnp.float32), 1, FP)              # (1, FP)
    w23 = jnp.concatenate(
        [_pad2(params["w2_t"].astype(jnp.float32), FP, FP),
         _pad2(params["w3_t"].astype(jnp.float32), FP, FP)], axis=1)  # (FP, 2*FP)
    b23 = jnp.concatenate(
        [_pad2(params["b2"].astype(jnp.float32), 1, FP),
         _pad2(params["b3"].astype(jnp.float32), 1, FP)], axis=1)     # (1, 2*FP)

    # --- batch tiling -----------------------------------------------------------
    tb = min(block_rows, _round_up(B, 8))   # sublane-aligned tile of batch rows
    b_pad = _round_up(B, tb)
    x_p = _pad2(x.astype(jnp.float32), b_pad, FP)                     # (B_pad, FP)
    n_tiles = b_pad // tb

    out = pl.pallas_call(
        _selector_kernel,
        out_shape=jax.ShapeDtypeStruct((b_pad, 2 * FP), jnp.float32),
        grid=(n_tiles,),
        in_specs=[
            pl.BlockSpec((tb, FP), lambda i: (i, 0)),        # x: tiled over batch
            pl.BlockSpec((FP, FP), lambda i: (0, 0)),        # w1: resident
            pl.BlockSpec((1, FP), lambda i: (0, 0)),         # b1: resident
            pl.BlockSpec((FP, 2 * FP), lambda i: (0, 0)),    # w2|w3 fused: resident
            pl.BlockSpec((1, 2 * FP), lambda i: (0, 0)),     # b2|b3 fused: resident
        ],
        out_specs=pl.BlockSpec((tb, 2 * FP), lambda i: (i, 0)),
        compiler_params=pltpu.CompilerParams(
            dimension_semantics=("parallel",),               # megacore-shardable on v7x
        ),
    )(x_p, w1, b1, w23, b23)

    out1 = out[:B, :F]
    out2 = out[:B, FP:FP + F]
    return out1, out2


def init_params(key, in_features=F, out_features=F):
    """Deterministic init mimicking PyTorch Linear default (uniform +/- 1/sqrt(in))."""
    bound = 1.0 / jnp.sqrt(jnp.float32(in_features))
    keys = jax.random.split(key, 6)

    def w(k):  # stored transposed: (in, out)
        return jax.random.uniform(k, (in_features, out_features), jnp.float32,
                                  -bound, bound)

    def b(k):
        return jax.random.uniform(k, (1, out_features), jnp.float32, -bound, bound)

    return {
        "w1_t": w(keys[0]), "b1": b(keys[1]),
        "w2_t": w(keys[2]), "b2": b(keys[3]),
        "w3_t": w(keys[4]), "b3": b(keys[5]),
    }


def _reference(x, p):
    h = jax.nn.sigmoid(x @ p["w1_t"] + p["b1"])
    return h @ p["w2_t"] + p["b2"], h @ p["w3_t"] + p["b3"]


if __name__ == "__main__":
    key = jax.random.PRNGKey(0)
    kx, kp = jax.random.split(key)

    B = 8
    x = jax.random.normal(kx, (B, F), jnp.float32)
    params = init_params(kp, F, F)

    out1, out2 = network_selector_forward(x, params)
    out1 = jax.block_until_ready(out1)
    out2 = jax.block_until_ready(out2)

    ref1, ref2 = _reference(x, params)
    assert out1.shape == (B, F) and out2.shape == (B, F)
    assert jnp.allclose(out1, ref1, atol=1e-4, rtol=1e-4)
    assert jnp.allclose(out2, ref2, atol=1e-4, rtol=1e-4)

    print("KERNEL_OK")
</pallas_src>

<mosaic_0001>
module attributes {stable_mosaic.version = 11 : i64} {
  func.func @_selector_kernel(%arg0: i32, %arg1: memref<8x256xf32, #tpu.memory_space<vmem>>, %arg2: memref<256x256xf32, #tpu.memory_space<vmem>>, %arg3: memref<1x256xf32, #tpu.memory_space<vmem>>, %arg4: memref<256x512xf32, #tpu.memory_space<vmem>>, %arg5: memref<1x512xf32, #tpu.memory_space<vmem>>, %arg6: memref<8x512xf32, #tpu.memory_space<vmem>>) attributes {dimension_semantics = [#tpu.dimension_semantics<parallel>], iteration_bounds = array<i64: 1>, scalar_prefetch = 0 : i64, scratch_operands = 0 : i64, tpu.core_type = #tpu.core_type<tc>, window_params = [{transform_indices = @transform_0, window_bounds = array<i64: 8, 256>}, {pipeline_mode = #tpu.pipeline_mode<synchronous>, transform_indices = @transform_1, window_bounds = array<i64: 256, 256>}, {pipeline_mode = #tpu.pipeline_mode<synchronous>, transform_indices = @transform_2, window_bounds = array<i64: 1, 256>}, {pipeline_mode = #tpu.pipeline_mode<synchronous>, transform_indices = @transform_3, window_bounds = array<i64: 256, 512>}, {pipeline_mode = #tpu.pipeline_mode<synchronous>, transform_indices = @transform_4, window_bounds = array<i64: 1, 512>}, {transform_indices = @transform_5, window_bounds = array<i64: 8, 512>}]} {
    %c0 = arith.constant 0 : index
    %c0_0 = arith.constant 0 : index
    %0 = vector.load %arg1[%c0, %c0_0] : memref<8x256xf32, #tpu.memory_space<vmem>>, vector<8x256xf32>
    %c0_1 = arith.constant 0 : index
    %c0_2 = arith.constant 0 : index
    %1 = vector.load %arg2[%c0_1, %c0_2] : memref<256x256xf32, #tpu.memory_space<vmem>>, vector<256x256xf32>
    %cst = arith.constant dense<0.000000e+00> : vector<8x256xf32>
    %2 = tpu.matmul %0, %1, %cst {dimension_numbers = #tpu.dot_dimension_numbers<[1], [0], [0], [1], [0, 0, 1, 1], [], []>} : vector<8x256xf32>, vector<256x256xf32>, vector<8x256xf32> -> vector<8x256xf32>
    %c0_3 = arith.constant 0 : index
    %c0_4 = arith.constant 0 : index
    %3 = vector.load %arg3[%c0_3, %c0_4] : memref<1x256xf32, #tpu.memory_space<vmem>>, vector<1x256xf32>
    %4 = vector.broadcast %3 : vector<1x256xf32> to vector<8x256xf32>
    %5 = arith.addf %2, %4 : vector<8x256xf32>
    %6 = arith.negf %5 : vector<8x256xf32>
    %7 = math.exp %6 : vector<8x256xf32>
    %cst_5 = arith.constant 1.000000e+00 : f32
    %8 = vector.broadcast %cst_5 : f32 to vector<8x256xf32>
    %9 = arith.addf %8, %7 : vector<8x256xf32>
    %10 = arith.divf %8, %9 : vector<8x256xf32>
    %c0_6 = arith.constant 0 : index
    %c0_7 = arith.constant 0 : index
    %11 = vector.load %arg4[%c0_6, %c0_7] : memref<256x512xf32, #tpu.memory_space<vmem>>, vector<256x512xf32>
    %cst_8 = arith.constant dense<0.000000e+00> : vector<8x512xf32>
    %12 = tpu.matmul %10, %11, %cst_8 {dimension_numbers = #tpu.dot_dimension_numbers<[1], [0], [0], [1], [0, 0, 1, 1], [], []>} : vector<8x256xf32>, vector<256x512xf32>, vector<8x512xf32> -> vector<8x512xf32>
    %c0_9 = arith.constant 0 : index
    %c0_10 = arith.constant 0 : index
    %13 = vector.load %arg5[%c0_9, %c0_10] : memref<1x512xf32, #tpu.memory_space<vmem>>, vector<1x512xf32>
    %14 = vector.broadcast %13 : vector<1x512xf32> to vector<8x512xf32>
    %15 = arith.addf %12, %14 : vector<8x512xf32>
    %c0_11 = arith.constant 0 : index
    %c0_12 = arith.constant 0 : index
    %16 = vector.load %arg6[%c0_11, %c0_12] : memref<8x512xf32, #tpu.memory_space<vmem>>, vector<8x512xf32>
    tpu.vector_store %arg6[%c0_11, %c0_12], %15 {strides = array<i32>} : memref<8x512xf32, #tpu.memory_space<vmem>>, vector<8x512xf32>,
    return
  }
  func.func @transform_0(%arg0: i32) -> (i32, i32) {
    %c0_i32 = arith.constant 0 : i32
    %c0_i32_0 = arith.constant 0 : i32
    return %arg0, %c0_i32 : i32, i32
  }
  func.func @transform_1(%arg0: i32) -> (i32, i32) {
    %c0_i32 = arith.constant 0 : i32
    %c0_i32_0 = arith.constant 0 : i32
    %c0_i32_1 = arith.constant 0 : i32
    return %c0_i32, %c0_i32_0 : i32, i32
  }
  func.func @transform_2(%arg0: i32) -> (i32, i32) {
    %c0_i32 = arith.constant 0 : i32
    %c0_i32_0 = arith.constant 0 : i32
    %c0_i32_1 = arith.constant 0 : i32
    return %c0_i32, %c0_i32_0 : i32, i32
  }
  func.func @transform_3(%arg0: i32) -> (i32, i32) {
    %c0_i32 = arith.constant 0 : i32
    %c0_i32_0 = arith.constant 0 : i32
    %c0_i32_1 = arith.constant 0 : i32
    return %c0_i32, %c0_i32_0 : i32, i32
  }
  func.func @transform_4(%arg0: i32) -> (i32, i32) {
    %c0_i32 = arith.constant 0 : i32
    %c0_i32_0 = arith.constant 0 : i32
    %c0_i32_1 = arith.constant 0 : i32
    return %c0_i32, %c0_i32_0 : i32, i32
  }
  func.func @transform_5(%arg0: i32) -> (i32, i32) {
    %c0_i32 = arith.constant 0 : i32
    %c0_i32_0 = arith.constant 0 : i32
    return %arg0, %c0_i32 : i32, i32
  }
}

</mosaic_0001>

<bundles_post_ra>
// kernel: tpu_custom_call.1
= control target key start
LH: loop header
LB: loop body
LE: loop exit
PB: predicated region body
PF: predicated region fallthrough
CT: control target
= control target key end

     0   :  { %10 = vsyncpa [#allocation3], 0  ;;  %s693_s0 = inlined_call_operand.hbm [shape: f32[8,256], index: 0, kind: input, shape index: {}]   ;;  %s694_s1 = inlined_call_operand.hbm [shape: f32[256,256], index: 1, kind: input, shape index: {}]   ;;  %s695_s2 = inlined_call_operand.vmem [shape: f32[1,256], index: 2, kind: input, shape index: {}]   ;;  %s696_s3 = inlined_call_operand.hbm [shape: f32[256,512], index: 3, kind: input, shape index: {}]   ;;  %s697_s4 = inlined_call_operand.vmem [shape: f32[1,512], index: 4, kind: input, shape index: {}]   ;;  %s698_s5 = inlined_call_operand.hbm [shape: f32[8,512], index: 5, kind: output, shape index: {}]  }
   0x1   :  { %11 = vsyncpa [#allocation6], 0 }
   0x2   :  { %12 = vsyncpa [#allocation4], 0  ;;  %s637_s18 = smov [#allocation5]  }
   0x3   :  { %s28_s19 = sshll.u32 %s637_s18, 4  ;;  %s29_s19 = int_to_ptr.vmem [resolvable:$true] %s28_s19 }
   0x4   :  { %s559_s20 = scalar_lea.vmem %s29_s19, 8192  ;;  %p564_p1 = scmp.lt.s32.totalorder %s29_s19, %s29_s19 }
   0x5   :  { %p560_p0 = scmp.ne.s32.totalorder %s29_s19, %s559_s20  ;;  %p565_p2 = scmp.lt.s32.totalorder %s559_s20, %s559_s20 }
   0x7   :  { %p566_p3 = por %p565_p2, %p564_p1 }
   0x9   :  { %p567_p4 = pnand %p566_p3, %p560_p0 }
   0xb   :  { %570 = shalt.err (!%p567_p4)
}
   0xc   :  { %s638_s21 = smov 256   ;;  %s639_s22 = smov 16  }
   0xd   :  { %34 = dma.hbm_to_vmem [thread:$0]  %s694_s1, 8192, %s29_s19, [#allocation6], %s638_s21, %s638_s21, %s639_s22  }
   0xe   :  { %s640_s25 = smov [#allocation2]   ;;  %s641_s27 = smov [#allocation7]  }
   0xf   :  { %s19_s26 = sshll.u32 %s640_s25, 4  ;;  %s42_s28 = sshll.u32 %s641_s27, 4  ;;  %s20_s26 = int_to_ptr.vmem [resolvable:$true] %s19_s26  ;;  %s43_s28 = int_to_ptr.vmem [resolvable:$true] %s42_s28 }
  0x10   :  { %s579_s29 = scalar_lea.vmem %s20_s26, 256  ;;  %p584_p6 = scmp.lt.s32.totalorder %s20_s26, %s20_s26 }
  0x11   :  { %p580_p5 = scmp.ne.s32.totalorder %s20_s26, %s579_s29  ;;  %p585_p7 = scmp.lt.s32.totalorder %s579_s29, %s579_s29 }
  0x13   :  { %p586_p8 = por %p585_p7, %p584_p6 }
  0x15   :  { %p587_p9 = pnand %p586_p8, %p580_p5 }
  0x17   :  { %590 = shalt.err (!%p587_p9)
}
  0x18   :  { %22 = dma.hbm_to_vmem [thread:$0]  %s693_s0, 256, %s20_s26, [#allocation3]  }
  0x19   :  { %s599_s7 = scalar_lea.vmem %s43_s28, 16384  ;;  %p604_p11 = scmp.lt.s32.totalorder %s43_s28, %s43_s28 }
  0x1a   :  { %p600_p10 = scmp.ne.s32.totalorder %s43_s28, %s599_s7  ;;  %p605_p12 = scmp.lt.s32.totalorder %s599_s7, %s599_s7 }
  0x1c   :  { %p606_p13 = por %p605_p12, %p604_p11 }
  0x1e   :  { %p607_p0 = pnand %p606_p13, %p600_p10 }
  0x20   :  { %610 = shalt.err (!%p607_p0)
}
  0x21   :  { %s642_s1 = smov 512   ;;  %s643_s8 = smov 32  }
  0x22   :  { %48 = dma.hbm_to_vmem [thread:$0]  %s696_s3, 16384, %s43_s28, [#allocation6], %s642_s1, %s642_s1, %s643_s8  }
  0x23   :  { %631 = dma.done.wait [#allocation3], 256  }
  0x24   :  { %632 = vsyncadd [#allocation3], 4294967040 }
  0x25   :  { %633 = dma.done.wait [#allocation6], 24576  }
  0x26   :  { %634 = vsyncadd [#allocation6], 4294942720  ;;  %v93_v0 = vld [vmem:[#allocation5 + $0xf8] sm:$0xff]  ;;  %v92_v1 = vld [vmem:[#allocation5 + $0xf0] sm:$0xff]  ;;  %s644_s12 = smov [#allocation8]  }
  0x27   :  { %v91_v2 = vld [vmem:[#allocation5 + $0xe8] sm:$0xff]  ;;  %138 = vmatprep.subr.mxu0 %v93_v0  ;;  %v90_v3 = vld [vmem:[#allocation5 + $0xe0] sm:$0xff]  ;;  %v89_v4 = vld [vmem:[#allocation5 + $0xd8] sm:$0xff]  ;;  %s523_s13 = sshll.u32 %s644_s12, 4  ;;  %s524_s13 = int_to_ptr.vmem [resolvable:$true] %s523_s13 }
  0x28   :  { %139 = vmatpush1.msra.mxu0 %v92_v1  ;;  %v88_v5 = vld [vmem:[#allocation5 + $0xd0] sm:$0xff]  ;;  %v87_v6 = vld [vmem:[#allocation5 + $0xc8] sm:$0xff]  ;;  %v86_v7 = vld [vmem:[#allocation5 + $0xc0] sm:$0xff]  ;;  %p616_p2 = scmp.lt.s32.totalorder %s524_s13, %s524_s13 }
  0x29   :  { %140 = vmatprep.subr.mxu0 %v91_v2  ;;  %v85_v8 = vld [vmem:[#allocation5 + $0xb8] sm:$0xff]  ;;  %v84_v9 = vld [vmem:[#allocation5 + $0xb0] sm:$0xff]  ;;  %v83_v10 = vld [vmem:[#allocation5 + $0xa8] sm:$0xff] }
  0x2a   :  { %141 = vmatpush1.msra.mxu0 %v90_v3  ;;  %v82_v11 = vld [vmem:[#allocation5 + $0xa0] sm:$0xff]  ;;  %v81_v12 = vld [vmem:[#allocation5 + $0x98] sm:$0xff]  ;;  %v80_v13 = vld [vmem:[#allocation5 + $0x90] sm:$0xff] }
  0x2b   :  { %142 = vmatprep.subr.mxu0 %v89_v4  ;;  %v79_v14 = vld [vmem:[#allocation5 + $0x88] sm:$0xff]  ;;  %v78_v15 = vld [vmem:[#allocation5 + $0x80] sm:$0xff]  ;;  %v77_v16 = vld [vmem:[#allocation5 + $0x78] sm:$0xff] }
  0x2c   :  { %143 = vmatpush1.msra.mxu0 %v88_v5  ;;  %v76_v17 = vld [vmem:[#allocation5 + $0x70] sm:$0xff]  ;;  %v75_v18 = vld [vmem:[#allocation5 + $0x68] sm:$0xff]  ;;  %v74_v19 = vld [vmem:[#allocation5 + $0x60] sm:$0xff] }
  0x2d   :  { %144 = vmatprep.subr.mxu0 %v87_v6  ;;  %v73_v20 = vld [vmem:[#allocation5 + $0x58] sm:$0xff]  ;;  %v72_v21 = vld [vmem:[#allocation5 + $0x50] sm:$0xff]  ;;  %v71_v22 = vld [vmem:[#allocation5 + $0x48] sm:$0xff] }
  0x2e   :  { %145 = vmatpush1.msra.mxu0 %v86_v7  ;;  %v70_v23 = vld [vmem:[#allocation5 + $0x40] sm:$0xff]  ;;  %v61_v24 = vld [vmem:[#allocation2 + $0x8] sm:$0xff]  ;;  %v282_v26 = vld [vmem:[#allocation7 + $0x1e8] sm:$0xff] }
  0x2f   :  { %146 = vmatprep.subr.mxu0 %v85_v8  ;;  %v69_v25 = vld [vmem:[#allocation5 + $0x38] sm:$0xff]  ;;  %202 = vmatprep.mubr.f32.mxu0 %v61_v24  ;;  %v281_v27 = vld [vmem:[#allocation7 + $0x1e0] sm:$0xff]  ;;  %v68_v28 = vld [vmem:[#allocation5 + $0x30] sm:$0xff] }
  0x30   :  { %147 = vmatpush1.msra.mxu0 %v84_v9  ;;  %371 = vmatprep.subr.mxu1 %v282_v26  ;;  %v278_v29 = vld [vmem:[#allocation7 + $0x1c8] sm:$0xff]  ;;  %v277_v31 = vld [vmem:[#allocation7 + $0x1c0] sm:$0xff]  ;;  %v65_v35 = vld [vmem:[#allocation5 + $0x18] sm:$0xff] }
  0x31   :  { %148 = vmatprep.subr.mxu0 %v83_v10  ;;  %v67_v30 = vld [vmem:[#allocation5 + $0x28] sm:$0xff]  ;;  %372 = vmatpush1.msra.mxu1 %v281_v27  ;;  %v66_v33 = vld [vmem:[#allocation5 + $0x20] sm:$0xff]  ;;  %v64_v37 = vld [vmem:[#allocation5 + $0x10] sm:$0xff] }
  0x32   :  { %149 = vmatpush1.msra.mxu0 %v82_v11  ;;  %v274_v32 = vld [vmem:[#allocation7 + $0x1a8] sm:$0xff]  ;;  %373 = vmatprep.subr.mxu1 %v278_v29  ;;  %v273_v34 = vld [vmem:[#allocation7 + $0x1a0] sm:$0xff]  ;;  %v125_v43 = vld [vmem:[#allocation5 + $0x1f8] sm:$0xff] }
  0x33   :  { %150 = vmatprep.subr.mxu0 %v81_v12  ;;  %374 = vmatpush1.msra.mxu1 %v277_v31  ;;  %v270_v36 = vld [vmem:[#allocation7 + $0x188] sm:$0xff]  ;;  %v269_v38 = vld [vmem:[#allocation7 + $0x180] sm:$0xff]  ;;  %v124_v45 = vld [vmem:[#allocation5 + $0x1f0] sm:$0xff] }
  0x34   :  { %151 = vmatpush1.msra.mxu0 %v80_v13  ;;  %375 = vmatprep.subr.mxu1 %v274_v32  ;;  %v63_v39 = vld [vmem:[#allocation5 + $0x8] sm:$0xff]  ;;  %v62_v41 = vld [vmem:[#allocation5] sm:$0xff]  ;;  %v121_v51 = vld [vmem:[#allocation5 + $0x1d8] sm:$0xff] }
  0x35   :  { %152 = vmatprep.subr.mxu0 %v79_v14  ;;  %376 = vmatpush1.msra.mxu1 %v273_v34  ;;  %v266_v40 = vld [vmem:[#allocation7 + $0x168] sm:$0xff]  ;;  %v265_v42 = vld [vmem:[#allocation7 + $0x160] sm:$0xff]  ;;  %v120_v53 = vld [vmem:[#allocation5 + $0x1d0] sm:$0xff] }
  0x36   :  { %153 = vmatpush1.msra.mxu0 %v78_v15  ;;  %377 = vmatprep.subr.mxu1 %v270_v36  ;;  %v262_v44 = vld [vmem:[#allocation7 + $0x148] sm:$0xff]  ;;  %v261_v46 = vld [vmem:[#allocation7 + $0x140] sm:$0xff]  ;;  %v117_v59 = vld [vmem:[#allocation5 + $0x1b8] sm:$0xff] }
  0x37   :  { %154 = vmatprep.subr.mxu0 %v77_v16  ;;  %378 = vmatpush1.msra.mxu1 %v269_v38  ;;  %v123_v47 = vld [vmem:[#allocation5 + $0x1e8] sm:$0xff]  ;;  %v122_v49 = vld [vmem:[#allocation5 + $0x1e0] sm:$0xff]  ;;  %v116_v61 = vld [vmem:[#allocation5 + $0x1b0] sm:$0xff] }
  0x38   :  { %155 = vmatpush1.msra.mxu0 %v76_v17  ;;  %379 = vmatprep.subr.mxu1 %v266_v40  ;;  %v258_v48 = vld [vmem:[#allocation7 + $0x128] sm:$0xff]  ;;  %v257_v50 = vld [vmem:[#allocation7 + $0x120] sm:$0xff]  ;;  %v113_v3 = vld [vmem:[#allocation5 + $0x198] sm:$0xff] }
  0x39   :  { %156 = vmatprep.subr.mxu0 %v75_v18  ;;  %380 = vmatpush1.msra.mxu1 %v265_v42  ;;  %v254_v52 = vld [vmem:[#allocation7 + $0x108] sm:$0xff]  ;;  %v253_v54 = vld [vmem:[#allocation7 + $0x100] sm:$0xff]  ;;  %v112_v5 = vld [vmem:[#allocation5 + $0x190] sm:$0xff] }
  0x3a   :  { %157 = vmatpush1.msra.mxu0 %v74_v19  ;;  %381 = vmatprep.subr.mxu1 %v262_v44  ;;  %v119_v55 = vld [vmem:[#allocation5 + $0x1c8] sm:$0xff]  ;;  %v118_v57 = vld [vmem:[#allocation5 + $0x1c0] sm:$0xff]  ;;  %v109_v11 = vld [vmem:[#allocation5 + $0x178] sm:$0xff] }
  0x3b   :  { %158 = vmatprep.subr.mxu0 %v73_v20  ;;  %382 = vmatpush1.msra.mxu1 %v261_v46  ;;  %v250_v56 = vld [vmem:[#allocation7 + $0xe8] sm:$0xff]  ;;  %v249_v58 = vld [vmem:[#allocation7 + $0xe0] sm:$0xff]  ;;  %v108_v12 = vld [vmem:[#allocation5 + $0x170] sm:$0xff] }
  0x3c   :  { %159 = vmatpush1.msra.mxu0 %v72_v21  ;;  %383 = vmatprep.subr.mxu1 %v258_v48  ;;  %v246_v60 = vld [vmem:[#allocation7 + $0xc8] sm:$0xff]  ;;  %v245_v62 = vld [vmem:[#allocation7 + $0xc0] sm:$0xff]  ;;  %v105_v15 = vld [vmem:[#allocation5 + $0x158] sm:$0xff] }
  0x3d   :  { %160 = vmatprep.subr.mxu0 %v71_v22  ;;  %384 = vmatpush1.msra.mxu1 %v257_v50  ;;  %v115_v63 = vld [vmem:[#allocation5 + $0x1a8] sm:$0xff]  ;;  %v114_v1 = vld [vmem:[#allocation5 + $0x1a0] sm:$0xff]  ;;  %v104_v16 = vld [vmem:[#allocation5 + $0x150] sm:$0xff] }
  0x3e   :  { %161 = vmatpush1.msra.mxu0 %v70_v23  ;;  %385 = vmatprep.subr.mxu1 %v254_v52  ;;  %v242_v0 = vld [vmem:[#allocation7 + $0xa8] sm:$0xff]  ;;  %v241_v2 = vld [vmem:[#allocation7 + $0xa0] sm:$0xff]  ;;  %v101_v19 = vld [vmem:[#allocation5 + $0x138] sm:$0xff] }
  0x3f   :  { %162 = vmatprep.subr.mxu0 %v69_v25  ;;  %386 = vmatpush1.msra.mxu1 %v253_v54  ;;  %v238_v4 = vld [vmem:[#allocation7 + $0x88] sm:$0xff]  ;;  %v237_v6 = vld [vmem:[#allocation7 + $0x80] sm:$0xff]  ;;  %v100_v20 = vld [vmem:[#allocation5 + $0x130] sm:$0xff] }
  0x40   :  { %163 = vmatpush1.msra.mxu0 %v68_v28  ;;  %387 = vmatprep.subr.mxu1 %v250_v56  ;;  %v111_v7 = vld [vmem:[#allocation5 + $0x188] sm:$0xff]  ;;  %v110_v9 = vld [vmem:[#allocation5 + $0x180] sm:$0xff]  ;;  %v97_v23 = vld [vmem:[#allocation5 + $0x118] sm:$0xff] }
  0x41   :  { %164 = vmatprep.subr.mxu0 %v67_v30  ;;  %388 = vmatpush1.msra.mxu1 %v249_v58  ;;  %v234_v8 = vld [vmem:[#allocation7 + $0x68] sm:$0xff]  ;;  %v233_v10 = vld [vmem:[#allocation7 + $0x60] sm:$0xff]  ;;  %v96_v24 = vld [vmem:[#allocation5 + $0x110] sm:$0xff] }
  0x42   :  { %165 = vmatpush1.msra.mxu0 %v66_v33  ;;  %389 = vmatprep.subr.mxu1 %v246_v60  ;;  %v107_v13 = vld [vmem:[#allocation5 + $0x168] sm:$0xff]  ;;  %v106_v14 = vld [vmem:[#allocation5 + $0x160] sm:$0xff]  ;;  %v60_v27 = vld [vmem:[#allocation2] sm:$0xff] }
  0x43   :  { %166 = vmatprep.subr.mxu0 %v65_v35  ;;  %390 = vmatpush1.msra.mxu1 %v245_v62  ;;  %v103_v17 = vld [vmem:[#allocation5 + $0x148] sm:$0xff]  ;;  %v102_v18 = vld [vmem:[#allocation5 + $0x140] sm:$0xff]  ;;  %v284_v28 = vld [vmem:[#allocation7 + $0x1f8] sm:$0xff] }
  0x44   :  { %167 = vmatpush1.msra.mxu0 %v64_v37  ;;  %391 = vmatprep.subr.mxu1 %v242_v0  ;;  %v99_v21 = vld [vmem:[#allocation5 + $0x128] sm:$0xff]  ;;  %v98_v22 = vld [vmem:[#allocation5 + $0x120] sm:$0xff]  ;;  %v283_v29 = vld [vmem:[#allocation7 + $0x1f0] sm:$0xff] }
  0x45   :  { %168 = vmatprep.subr.mxu0 %v63_v39  ;;  %392 = vmatpush1.msra.mxu1 %v241_v2  ;;  %v95_v25 = vld [vmem:[#allocation5 + $0x108] sm:$0xff]  ;;  %v94_v26 = vld [vmem:[#allocation5 + $0x100] sm:$0xff]  ;;  %v280_v30 = vld [vmem:[#allocation7 + $0x1d8] sm:$0xff] }
  0x46   :  { %169 = vmatpush1.msra.mxu0 %v62_v41  ;;  %393 = vmatprep.subr.mxu1 %v238_v4  ;;  %v279_v31 = vld [vmem:[#allocation7 + $0x1d0] sm:$0xff]  ;;  %v276_v32 = vld [vmem:[#allocation7 + $0x1b8] sm:$0xff]  ;;  %v230_v54 = vld [vmem:[#allocation7 + $0x48] sm:$0xff] }
  0x47   :  { %170 = vmatprep.subr.mxu0 %v125_v43  ;;  %394 = vmatpush1.msra.mxu1 %v237_v6  ;;  %v275_v33 = vld [vmem:[#allocation7 + $0x1b0] sm:$0xff]  ;;  %v272_v34 = vld [vmem:[#allocation7 + $0x198] sm:$0xff]  ;;  %v229_v56 = vld [vmem:[#allocation7 + $0x40] sm:$0xff] }
  0x48   :  { %171 = vmatpush2.msra.mxu0 %v124_v45  ;;  %395 = vmatprep.subr.mxu1 %v234_v8  ;;  %v271_v35 = vld [vmem:[#allocation7 + $0x190] sm:$0xff]  ;;  %v268_v36 = vld [vmem:[#allocation7 + $0x178] sm:$0xff]  ;;  %v226_v58 = vld [vmem:[#allocation7 + $0x28] sm:$0xff] }
  0x49   :  { %172 = vmatprep.subr.mxu0 %v123_v47  ;;  %396 = vmatpush1.msra.mxu1 %v233_v10  ;;  %v267_v37 = vld [vmem:[#allocation7 + $0x170] sm:$0xff]  ;;  %v264_v38 = vld [vmem:[#allocation7 + $0x158] sm:$0xff]  ;;  %v225_v60 = vld [vmem:[#allocation7 + $0x20] sm:$0xff] }
  0x4a   :  { %173 = vmatpush2.msra.mxu0 %v122_v49  ;;  %v263_v39 = vld [vmem:[#allocation7 + $0x150] sm:$0xff]  ;;  %v260_v40 = vld [vmem:[#allocation7 + $0x138] sm:$0xff]  ;;  %397 = vmatprep.subr.mxu1 %v230_v54  ;;  %v222_v62 = vld [vmem:[#allocation7 + $0x8] sm:$0xff] }
  0x4b   :  { %174 = vmatprep.subr.mxu0 %v121_v51  ;;  %v259_v41 = vld [vmem:[#allocation7 + $0x130] sm:$0xff]  ;;  %v256_v42 = vld [vmem:[#allocation7 + $0x118] sm:$0xff]  ;;  %398 = vmatpush1.msra.mxu1 %v229_v56  ;;  %v221_v0 = vld [vmem:[#allocation7] sm:$0xff] }
  0x4c   :  { %175 = vmatpush2.msra.mxu0 %v120_v53  ;;  %v255_v43 = vld [vmem:[#allocation7 + $0x110] sm:$0xff]  ;;  %v252_v44 = vld [vmem:[#allocation7 + $0xf8] sm:$0xff]  ;;  %399 = vmatprep.subr.mxu1 %v226_v58  ;;  %v346_v2 = vld [vmem:[#allocation7 + $0x3e8] sm:$0xff] }
  0x4d   :  { %176 = vmatprep.subr.mxu0 %v119_v55  ;;  %v251_v45 = vld [vmem:[#allocation7 + $0xf0] sm:$0xff]  ;;  %v248_v46 = vld [vmem:[#allocation7 + $0xd8] sm:$0xff]  ;;  %400 = vmatpush1.msra.mxu1 %v225_v60  ;;  %v345_v4 = vld [vmem:[#allocation7 + $0x3e0] sm:$0xff] }
  0x4e   :  { %177 = vmatpush2.msra.mxu0 %v118_v57  ;;  %v247_v47 = vld [vmem:[#allocation7 + $0xd0] sm:$0xff]  ;;  %v244_v48 = vld [vmem:[#allocation7 + $0xb8] sm:$0xff]  ;;  %401 = vmatprep.subr.mxu1 %v222_v62  ;;  %v342_v6 = vld [vmem:[#allocation7 + $0x3c8] sm:$0xff] }
  0x4f   :  { %178 = vmatprep.subr.mxu0 %v117_v59  ;;  %v243_v49 = vld [vmem:[#allocation7 + $0xb0] sm:$0xff]  ;;  %v240_v50 = vld [vmem:[#allocation7 + $0x98] sm:$0xff]  ;;  %402 = vmatpush1.msra.mxu1 %v221_v0  ;;  %v341_v8 = vld [vmem:[#allocation7 + $0x3c0] sm:$0xff] }
  0x50   :  { %179 = vmatpush2.msra.mxu0 %v116_v61  ;;  %v239_v51 = vld [vmem:[#allocation7 + $0x90] sm:$0xff]  ;;  %v236_v52 = vld [vmem:[#allocation7 + $0x78] sm:$0xff]  ;;  %403 = vmatprep.subr.mxu1 %v346_v2  ;;  %v338_v10 = vld [vmem:[#allocation7 + $0x3a8] sm:$0xff]  ;;  %v128_v2 = vlaneseq }
  0x51   :  { %180 = vmatprep.subr.mxu0 %v115_v63  ;;  %v235_v53 = vld [vmem:[#allocation7 + $0x70] sm:$0xff]  ;;  %v232_v55 = vld [vmem:[#allocation7 + $0x58] sm:$0xff]  ;;  %404 = vmatpush2.msra.mxu1 %v345_v4  ;;  %v294_v54 = vld [vmem:[#allocation7 + $0x248] sm:$0xff] }
  0x52   :  { %181 = vmatpush2.msra.mxu0 %v114_v1  ;;  %v231_v57 = vld [vmem:[#allocation7 + $0x50] sm:$0xff]  ;;  %v228_v59 = vld [vmem:[#allocation7 + $0x38] sm:$0xff]  ;;  %405 = vmatprep.subr.mxu1 %v342_v6  ;;  %v293_v56 = vld [vmem:[#allocation7 + $0x240] sm:$0xff] }
  0x53   :  { %182 = vmatprep.subr.mxu0 %v113_v3  ;;  %v227_v61 = vld [vmem:[#allocation7 + $0x30] sm:$0xff]  ;;  %v224_v63 = vld [vmem:[#allocation7 + $0x18] sm:$0xff]  ;;  %406 = vmatpush2.msra.mxu1 %v341_v8  ;;  %v290_v58 = vld [vmem:[#allocation7 + $0x228] sm:$0xff] }
  0x54   :  { %183 = vmatpush2.msra.mxu0 %v112_v5  ;;  %v223_v1 = vld [vmem:[#allocation7 + $0x10] sm:$0xff]  ;;  %v348_v3 = vld [vmem:[#allocation7 + $0x3f8] sm:$0xff]  ;;  %407 = vmatprep.subr.mxu1 %v338_v10  ;;  %v289_v60 = vld [vmem:[#allocation7 + $0x220] sm:$0xff] }
  0x55   :  { %184 = vmatprep.subr.mxu0 %v111_v7  ;;  %v347_v5 = vld [vmem:[#allocation7 + $0x3f0] sm:$0xff]  ;;  %v344_v7 = vld [vmem:[#allocation7 + $0x3d8] sm:$0xff]  ;;  %v286_v62 = vld [vmem:[#allocation7 + $0x208] sm:$0xff] }
  0x56   :  { %185 = vmatpush2.msra.mxu0 %v110_v9  ;;  %v343_v9 = vld [vmem:[#allocation7 + $0x3d0] sm:$0xff]  ;;  %v285_v0 = vld [vmem:[#allocation7 + $0x200] sm:$0xff] }
  0x57   :  { %186 = vmatprep.subr.mxu0 %v109_v11  ;;  %v340_v11 = vld [vmem:[#allocation7 + $0x3b8] sm:$0xff] }
  0x58   :  { %187 = vmatpush2.msra.mxu0 %v108_v12  ;;  %v337_v12 = vld [vmem:[#allocation7 + $0x3a0] sm:$0xff] }
  0x59   :  { %188 = vmatprep.subr.mxu0 %v107_v13  ;;  %v339_v13 = vld [vmem:[#allocation7 + $0x3b0] sm:$0xff]  ;;  %408 = vmatpush2.msra.mxu1 %v337_v12 }
  0x5a   :  { %189 = vmatpush2.msra.mxu0 %v106_v14  ;;  %v334_v14 = vld [vmem:[#allocation7 + $0x388] sm:$0xff] }
  0x5b   :  { %190 = vmatprep.subr.mxu0 %v105_v15  ;;  %v336_v15 = vld [vmem:[#allocation7 + $0x398] sm:$0xff]  ;;  %409 = vmatprep.subr.mxu1 %v334_v14 }
  0x5c   :  { %191 = vmatpush2.msra.mxu0 %v104_v16  ;;  %v333_v16 = vld [vmem:[#allocation7 + $0x380] sm:$0xff] }
  0x5d   :  { %192 = vmatprep.subr.mxu0 %v103_v17  ;;  %v335_v17 = vld [vmem:[#allocation7 + $0x390] sm:$0xff]  ;;  %410 = vmatpush2.msra.mxu1 %v333_v16 }
  0x5e   :  { %193 = vmatpush2.msra.mxu0 %v102_v18  ;;  %v330_v18 = vld [vmem:[#allocation7 + $0x368] sm:$0xff] }
  0x5f   :  { %194 = vmatprep.subr.mxu0 %v101_v19  ;;  %v332_v19 = vld [vmem:[#allocation7 + $0x378] sm:$0xff]  ;;  %411 = vmatprep.subr.mxu1 %v330_v18 }
  0x60   :  { %195 = vmatpush2.msra.mxu0 %v100_v20  ;;  %v329_v20 = vld [vmem:[#allocation7 + $0x360] sm:$0xff] }
  0x61   :  { %196 = vmatprep.subr.mxu0 %v99_v21  ;;  %v331_v21 = vld [vmem:[#allocation7 + $0x370] sm:$0xff]  ;;  %412 = vmatpush2.msra.mxu1 %v329_v20 }
  0x62   :  { %197 = vmatpush2.msra.mxu0 %v98_v22  ;;  %v326_v22 = vld [vmem:[#allocation7 + $0x348] sm:$0xff] }
  0x63   :  { %198 = vmatprep.subr.mxu0 %v97_v23  ;;  %v328_v23 = vld [vmem:[#allocation7 + $0x358] sm:$0xff]  ;;  %413 = vmatprep.subr.mxu1 %v326_v22  ;;  %v349_v22 = vld [vmem:[%s697_s4] sm:$0xf]  ;;  %s611_s4 = scalar_lea.vmem %s524_s13, 512 }
  0x64   :  { %199 = vmatpush2.msra.mxu0 %v96_v24  ;;  %v325_v24 = vld [vmem:[#allocation7 + $0x340] sm:$0xff]  ;;  %p612_p1 = scmp.ne.s32.totalorder %s524_s13, %s611_s4  ;;  %p617_p3 = scmp.lt.s32.totalorder %s611_s4, %s611_s4 }
  0x65   :  { %200 = vmatprep.subr.mxu0 %v95_v25  ;;  %v327_v25 = vld [vmem:[#allocation7 + $0x350] sm:$0xff]  ;;  %414 = vmatpush2.msra.mxu1 %v325_v24 }
  0x66   :  { %201 = vmatpush2.msra.mxu0 %v94_v26  ;;  %v322_v26 = vld [vmem:[#allocation7 + $0x328] sm:$0xff]  ;;  %p618_p4 = por %p617_p3, %p616_p2 }
  0x67   :  { %203 = vmatmul.mubr.f32.vlgmr.msra.gmra.mxu0 %v60_v27  ;;  %442 = vmatprep.subr.mxu0 %v284_v28  ;;  %v324_v27 = vld [vmem:[#allocation7 + $0x338] sm:$0xff]  ;;  %v321_v28 = vld [vmem:[#allocation7 + $0x320] sm:$0xff] }
  0x68   :  { %443 = vmatpush1.msra.mxu0 %v283_v29  ;;  %415 = vmatprep.subr.mxu1 %v322_v26  ;;  %v323_v29 = vld [vmem:[#allocation7 + $0x330] sm:$0xff]  ;;  %p619_p5 = pnand %p618_p4, %p612_p1 }
  0x69   :  { %444 = vmatprep.subr.mxu0 %v280_v30  ;;  %416 = vmatpush2.msra.mxu1 %v321_v28  ;;  %v318_v30 = vld [vmem:[#allocation7 + $0x308] sm:$0xff] }
  0x6a   :  { %445 = vmatpush1.msra.mxu0 %v279_v31  ;;  %v320_v31 = vld [vmem:[#allocation7 + $0x318] sm:$0xff]  ;;  %417 = vmatprep.subr.mxu1 %v318_v30 }
  0x6b   :  { %446 = vmatprep.subr.mxu0 %v276_v32  ;;  %v317_v32 = vld [vmem:[#allocation7 + $0x300] sm:$0xff] }
  0x6c   :  { %447 = vmatpush1.msra.mxu0 %v275_v33  ;;  %v319_v33 = vld [vmem:[#allocation7 + $0x310] sm:$0xff]  ;;  %418 = vmatpush2.msra.mxu1 %v317_v32 }
  0x6d   :  { %448 = vmatprep.subr.mxu0 %v272_v34  ;;  %v314_v34 = vld [vmem:[#allocation7 + $0x2e8] sm:$0xff] }
  0x6e   :  { %449 = vmatpush1.msra.mxu0 %v271_v35  ;;  %v316_v35 = vld [vmem:[#allocation7 + $0x2f8] sm:$0xff]  ;;  %419 = vmatprep.subr.mxu1 %v314_v34 }
  0x6f   :  { %450 = vmatprep.subr.mxu0 %v268_v36  ;;  %v313_v36 = vld [vmem:[#allocation7 + $0x2e0] sm:$0xff] }
  0x70   :  { %451 = vmatpush1.msra.mxu0 %v267_v37  ;;  %v315_v37 = vld [vmem:[#allocation7 + $0x2f0] sm:$0xff]  ;;  %420 = vmatpush2.msra.mxu1 %v313_v36 }
  0x71   :  { %452 = vmatprep.subr.mxu0 %v264_v38  ;;  %v310_v38 = vld [vmem:[#allocation7 + $0x2c8] sm:$0xff] }
  0x72   :  { %453 = vmatpush1.msra.mxu0 %v263_v39  ;;  %v312_v39 = vld [vmem:[#allocation7 + $0x2d8] sm:$0xff]  ;;  %421 = vmatprep.subr.mxu1 %v310_v38 }
  0x73   :  { %454 = vmatprep.subr.mxu0 %v260_v40  ;;  %v309_v40 = vld [vmem:[#allocation7 + $0x2c0] sm:$0xff] }
  0x74   :  { %455 = vmatpush1.msra.mxu0 %v259_v41  ;;  %v311_v41 = vld [vmem:[#allocation7 + $0x2d0] sm:$0xff]  ;;  %422 = vmatpush2.msra.mxu1 %v309_v40 }
  0x75   :  { %456 = vmatprep.subr.mxu0 %v256_v42  ;;  %v306_v42 = vld [vmem:[#allocation7 + $0x2a8] sm:$0xff] }
  0x76   :  { %457 = vmatpush1.msra.mxu0 %v255_v43  ;;  %v308_v43 = vld [vmem:[#allocation7 + $0x2b8] sm:$0xff]  ;;  %423 = vmatprep.subr.mxu1 %v306_v42 }
  0x77   :  { %458 = vmatprep.subr.mxu0 %v252_v44  ;;  %v305_v44 = vld [vmem:[#allocation7 + $0x2a0] sm:$0xff] }
  0x78   :  { %459 = vmatpush1.msra.mxu0 %v251_v45  ;;  %v307_v45 = vld [vmem:[#allocation7 + $0x2b0] sm:$0xff]  ;;  %424 = vmatpush2.msra.mxu1 %v305_v44 }
  0x79   :  { %460 = vmatprep.subr.mxu0 %v248_v46  ;;  %v302_v46 = vld [vmem:[#allocation7 + $0x288] sm:$0xff] }
  0x7a   :  { %461 = vmatpush1.msra.mxu0 %v247_v47  ;;  %v304_v47 = vld [vmem:[#allocation7 + $0x298] sm:$0xff]  ;;  %425 = vmatprep.subr.mxu1 %v302_v46 }
  0x7b   :  { %462 = vmatprep.subr.mxu0 %v244_v48  ;;  %v301_v48 = vld [vmem:[#allocation7 + $0x280] sm:$0xff] }
  0x7c   :  { %463 = vmatpush1.msra.mxu0 %v243_v49  ;;  %v303_v49 = vld [vmem:[#allocation7 + $0x290] sm:$0xff]  ;;  %426 = vmatpush2.msra.mxu1 %v301_v48 }
  0x7d   :  { %464 = vmatprep.subr.mxu0 %v240_v50  ;;  %v298_v50 = vld [vmem:[#allocation7 + $0x268] sm:$0xff] }
  0x7e   :  { %465 = vmatpush1.msra.mxu0 %v239_v51  ;;  %v300_v51 = vld [vmem:[#allocation7 + $0x278] sm:$0xff]  ;;  %427 = vmatprep.subr.mxu1 %v298_v50 }
  0x7f   :  { %466 = vmatprep.subr.mxu0 %v236_v52  ;;  %v297_v52 = vld [vmem:[#allocation7 + $0x260] sm:$0xff] }
  0x80   :  { %467 = vmatpush1.msra.mxu0 %v235_v53  ;;  %v299_v53 = vld [vmem:[#allocation7 + $0x270] sm:$0xff]  ;;  %428 = vmatpush2.msra.mxu1 %v297_v52 }
  0x81   :  { %468 = vmatprep.subr.mxu0 %v232_v55  ;;  %v296_v55 = vld [vmem:[#allocation7 + $0x258] sm:$0xff]  ;;  %429 = vmatprep.subr.mxu1 %v294_v54 }
  0x82   :  { %469 = vmatpush1.msra.mxu0 %v231_v57  ;;  %v295_v57 = vld [vmem:[#allocation7 + $0x250] sm:$0xff]  ;;  %430 = vmatpush2.msra.mxu1 %v293_v56 }
  0x83   :  { %470 = vmatprep.subr.mxu0 %v228_v59  ;;  %v292_v59 = vld [vmem:[#allocation7 + $0x238] sm:$0xff]  ;;  %431 = vmatprep.subr.mxu1 %v290_v58 }
  0x84   :  { %471 = vmatpush1.msra.mxu0 %v227_v61  ;;  %v291_v61 = vld [vmem:[#allocation7 + $0x230] sm:$0xff]  ;;  %432 = vmatpush2.msra.mxu1 %v289_v60 }
  0x85   :  { %472 = vmatprep.subr.mxu0 %v224_v63  ;;  %v288_v63 = vld [vmem:[#allocation7 + $0x218] sm:$0xff]  ;;  %433 = vmatprep.subr.mxu1 %v286_v62 }
  0x86   :  { %473 = vmatpush1.msra.mxu0 %v223_v1  ;;  %v287_v1 = vld [vmem:[#allocation7 + $0x210] sm:$0xff]  ;;  %434 = vmatpush2.msra.mxu1 %v285_v0 }
  0x87   :  { %474 = vmatprep.subr.mxu0 %v348_v3  ;;  %v129_v3 = vshrl.u32 %v128_v2, 7 }
  0x88   :  { %475 = vmatpush2.msra.mxu0 %v347_v5  ;;  %v126_v5 = vld [vmem:[%s695_s2] sm:$0x3] }
  0x89   :  { %476 = vmatprep.subr.mxu0 %v344_v7  ;;  %v130_v4 = vsub.s32 0, %v129_v3  ;;  %v134_v6 = vsub.s32 1, %v129_v3 }
  0x8a   :  { %477 = vmatpush2.msra.mxu0 %v343_v9 }
  0x8b   :  { %478 = vmatprep.subr.mxu0 %v340_v11  ;;  %v131_v7 = vrot.slane %v126_v5, %v130_v4  ;;  %v135_v8 = vrot.slane %v126_v5, %v134_v6  ;;  %v354_v24 = vrot.slane %v349_v22, %v130_v4  ;;  %v358_v26 = vrot.slane %v349_v22, %v134_v6 }
  0x8c   :  { %479 = vmatpush2.msra.mxu0 %v339_v13 }
  0x8d   :  { %480 = vmatprep.subr.mxu0 %v336_v15 }
  0x8e   :  { %481 = vmatpush2.msra.mxu0 %v335_v17 }
  0x8f   :  { %482 = vmatprep.subr.mxu0 %v332_v19 }
  0x90   :  { %483 = vmatpush2.msra.mxu0 %v331_v21  ;;  %v361_v21 = vsub.s32 2, %v129_v3 }
  0x91   :  { %484 = vmatprep.subr.mxu0 %v328_v23  ;;  %v365_v23 = vsub.s32 3, %v129_v3 }
  0x92   :  { %485 = vmatpush2.msra.mxu0 %v327_v25  ;;  %v362_v25 = vrot.slane %v349_v22, %v361_v21 }
  0x93   :  { %486 = vmatprep.subr.mxu0 %v324_v27  ;;  %v366_v27 = vrot.slane %v349_v22, %v365_v23 }
  0x94   :  { %487 = vmatpush2.msra.mxu0 %v323_v29 }
  0x95   :  { %488 = vmatprep.subr.mxu0 %v320_v31 }
  0x96   :  { %489 = vmatpush2.msra.mxu0 %v319_v33 }
  0x97   :  { %490 = vmatprep.subr.mxu0 %v316_v35 }
  0x98   :  { %491 = vmatpush2.msra.mxu0 %v315_v37 }
  0x99   :  { %492 = vmatprep.subr.mxu0 %v312_v39 }
  0x9a   :  { %493 = vmatpush2.msra.mxu0 %v311_v41 }
  0x9b   :  { %494 = vmatprep.subr.mxu0 %v308_v43 }
  0x9c   :  { %495 = vmatpush2.msra.mxu0 %v307_v45 }
  0x9d   :  { %496 = vmatprep.subr.mxu0 %v304_v47 }
  0x9e   :  { %497 = vmatpush2.msra.mxu0 %v303_v49 }
  0x9f   :  { %498 = vmatprep.subr.mxu0 %v300_v51 }
  0xa0   :  { %499 = vmatpush2.msra.mxu0 %v299_v53 }
  0xa1   :  { %500 = vmatprep.subr.mxu0 %v296_v55 }
  0xa2   :  { %501 = vmatpush2.msra.mxu0 %v295_v57 }
  0xa3   :  { %502 = vmatprep.subr.mxu0 %v292_v59 }
  0xa4   :  { %503 = vmatpush2.msra.mxu0 %v291_v61 }
  0xa5   :  { %504 = vmatprep.subr.mxu0 %v288_v63 }
  0xa6   :  { %505 = vmatpush2.msra.mxu0 %v287_v1 }
 0x127   :  { %v204_v9 = vpop.f32.mrf.mxu0 }
 0x128   :  { %v205_v10 = vadd.f32 %v204_v9, %v131_v7 }
 0x129   :  { %v206_v11 = vpop.f32.mrf.mxu0 }
 0x12a   :  { %v533_v12 = vmul.f32 -1.442695, %v205_v10  ;;  %v207_v13 = vadd.f32 %v206_v11, %v135_v8 }
 0x12c   :  { %543 = vpow2.f32 %v533_v12  ;;  %v534_v14 = vmul.f32 -1.442695, %v207_v13 }
 0x12e   :  { %545 = vpow2.f32 %v534_v14 }
 0x139   :  { %v544_v15 = vpop.eup %543 }
 0x13a   :  { %v215_v17 = vadd.f32 1.0, %v544_v15 }
 0x13b   :  { %v546_v16 = vpop.eup %545 }
 0x13c   :  { %v216_v18 = vadd.f32 1.0, %v546_v16 }
 0x13e   :  { %547 = vrcp.f32 %v216_v18 }
 0x13f   :  { %549 = vrcp.f32 %v215_v17 }
 0x14b   :  { %v548_v19 = vpop.eup %547 }
 0x14c   :  { %v550_v20 = vpop.eup %549  ;;  %435 = vmatprep.mubr.f32.mxu1 %v548_v19  ;;  %506 = vmatprep.mubr.f32.mxu0 %v548_v19 }
 0x14d   :  { %436 = vmatmul.mubr.f32.vlgmr.msra.gmra.mxu1 %v550_v20  ;;  %507 = vmatmul.mubr.f32.vlgmr.msra.gmra.mxu0 %v550_v20 }
 0x20d   :  { %v437_v28 = vpop.f32.mrf.mxu1  ;;  %v508_v29 = vpop.f32.mrf.mxu0 }
 0x20e   :  { %v438_v30 = vadd.f32 %v437_v28, %v354_v24  ;;  %v509_v31 = vadd.f32 %v508_v29, %v362_v25 }
 0x20f   :  { %v439_v32 = vpop.f32.mrf.mxu1  ;;  %v510_v33 = vpop.f32.mrf.mxu0 }
 0x210   :  { %513 = vst [vmem:[#allocation8] sm:$0xff] %v438_v30  ;;  %515 = vst [vmem:[#allocation8 + $0x10] sm:$0xff] %v509_v31  ;;  %v440_v34 = vadd.f32 %v439_v32, %v358_v26  ;;  %v511_v35 = vadd.f32 %v510_v33, %v366_v27 }
 0x212   :  { %514 = vst [vmem:[#allocation8 + $0x8] sm:$0xff] %v440_v34  ;;  %516 = vst [vmem:[#allocation8 + $0x18] sm:$0xff] %v511_v35 }
 0x213   :  { %622 = shalt.err (!%p619_p5)
}
 0x214   :  { %526 = dma.vmem_to_hbm [thread:$0]  %s524_s13, 512, %s698_s5, [#allocation4]  }
 0x215   :  { %635 = dma.done.wait [#allocation4], 512  }
 0x216   :  { %636 = vsyncadd [#allocation4], 4294966784 }
 0x217   :  { %530 = vsyncpa [#allocation3], 1 }
 0x218   :  { %531 = vsyncpa [#allocation6], 1 }
 0x219   :  { %532 = vsyncpa [#allocation4], 1 }

</bundles_post_ra>
